<compile_context>
chip_gen: v7x
topology: tpu7x:2x2x1
jax: 0.10.0
libtpu: 0.0.40
codegen_flags: <defaults>
</compile_context>

<pallas_src>
import functools

import numpy as np
import jax
import jax.numpy as jnp
from jax.experimental import pallas as pl
from jax.experimental.pallas import tpu as pltpu


def _down_kernel(x_ref, p_ref, w_ref, b_ref, o_ref, *, nb):
    # x_ref : (nb, C_in, L)    native-layout input block (original dtype)
    # p_ref : (L, Ld)          pool matrix, MXU dtype, 1.0 at [j*factor+f, j]
    # w_ref : (3, C_out, C_in) conv taps (k=0,1,2), pre-scaled by 1/factor, MXU dtype
    # b_ref : (C_out, 1)       conv bias, f32
    # o_ref : (nb, C_out, Ld)  native-layout output block
    mdt = p_ref.dtype
    ld = o_ref.shape[-1]

    # Hoisted loads (shared across the per-batch loop).
    p = p_ref[...]
    w0 = w_ref[0]          # tap k=0  (left  neighbour)
    w1 = w_ref[1]          # tap k=1  (center)
    w2 = w_ref[2]          # tap k=2  (right neighbour)
    b = b_ref[...]

    # 0/1 keep-masks realizing Conv1d's zero padding after the lane rolls.
    lane = jax.lax.broadcasted_iota(jnp.int32, (1, ld), 1)
    keep_l = (lane > 0).astype(jnp.float32)        # zero column 0
    keep_r = (lane < ld - 1).astype(jnp.float32)   # zero column Ld-1

    for bi in range(nb):                           # nb is small & static
        xb = x_ref[bi].astype(mdt)                                       # (C_in, L)
        # AvgPool1d (sum; 1/factor folded into the weights) on the MXU.
        pooled = jnp.dot(xb, p, preferred_element_type=jnp.float32)      # (C_in, Ld) f32

        center = pooled.astype(mdt)
        left = (pltpu.roll(pooled, shift=1, axis=1) * keep_l).astype(mdt)        # pooled[:, j-1]
        right = (pltpu.roll(pooled, shift=ld - 1, axis=1) * keep_r).astype(mdt)  # pooled[:, j+1]

        # Conv1d(k=3, pad=1): three accumulating MXU matmuls, taps kept in vregs.
        acc = jnp.dot(w1, center, preferred_element_type=jnp.float32)
        acc = acc + jnp.dot(w0, left, preferred_element_type=jnp.float32)
        acc = acc + jnp.dot(w2, right, preferred_element_type=jnp.float32)

        # Bias + ReLU epilogue in f32, store native (C_out, Ld) slab.
        o_ref[bi] = jnp.maximum(acc + b, 0.0).astype(o_ref.dtype)


def _pick_nb(B, per_batch_bytes, max_step_bytes, max_nb):
    """Batches per grid step.

    Guarantees >= 2 grid steps whenever B >= 2 (v7x has 2 TensorCores and the
    "parallel" grid axis is what shards work across them), then picks the
    largest divisor of B whose per-step HBM traffic stays under the byte cap
    (keeps the double-buffered VMEM footprint bounded on v7x's 64 MiB).
    `max_nb` bounds the statically unrolled per-batch loop.
    """
    if B <= 1:
        return 1
    cands = [d for d in range(1, min(B // 2, max_nb) + 1) if B % d == 0]
    fitting = [d for d in cands if d * per_batch_bytes <= max_step_bytes]
    if fitting:
        return max(fitting)
    return min(cands)


def downsampling_pallas(x, weight, bias, factor, *, mxu_dtype=jnp.bfloat16,
                        out_dtype=None, max_step_bytes=4 * 1024 * 1024, max_nb=8):
    """AvgPool1d(factor) -> Conv1d(k=3, pad=1) -> ReLU.

    x: (B, C_in, L) f32; weight: (C_out, C_in, 3); bias: (C_out,).
    Returns (B, C_out, L // factor) in `out_dtype` (default: x.dtype).
    """
    B, C_in, L = x.shape
    C_out = weight.shape[0]
    Ld = L // factor
    assert Ld >= 1
    if Ld * factor != L:
        # PyTorch AvgPool1d silently drops trailing elements when L % factor != 0.
        x = x[:, :, :Ld * factor]
        L = Ld * factor
    out_dtype = x.dtype if out_dtype is None else out_dtype

    # Pool matrix with 1.0 entries (exact in bf16); 1/factor is folded into the
    # conv weights below (out of the per-step hot loop).
    p_np = np.zeros((L, Ld), dtype=np.float32)
    cols = np.arange(Ld)
    for f in range(factor):
        p_np[cols * factor + f, cols] = 1.0
    p_mat = jnp.asarray(p_np, dtype=mxu_dtype)

    # (C_out, C_in, 3) -> (3, C_out, C_in), pre-scaled by 1/factor (wrapper-side,
    # tiny, done once).  Bias stays f32 for the epilogue.
    w3 = (jnp.transpose(weight, (2, 0, 1)) * (1.0 / factor)).astype(mxu_dtype)
    b2 = bias.reshape(C_out, 1).astype(jnp.float32)

    per_batch_bytes = (C_in * L * jnp.dtype(x.dtype).itemsize
                       + C_out * Ld * jnp.dtype(out_dtype).itemsize)
    nb = _pick_nb(B, per_batch_bytes, max_step_bytes, max_nb)
    num_blocks = B // nb

    kernel = functools.partial(_down_kernel, nb=nb)

    out = pl.pallas_call(
        kernel,
        out_shape=jax.ShapeDtypeStruct((B, C_out, Ld), out_dtype),
        grid_spec=pltpu.PrefetchScalarGridSpec(
            num_scalar_prefetch=0,
            grid=(num_blocks,),
            in_specs=[
                pl.BlockSpec((nb, C_in, L), lambda i: (i, 0, 0)),     # x (native layout)
                pl.BlockSpec((L, Ld), lambda i: (0, 0)),              # pool matrix
                pl.BlockSpec((3, C_out, C_in), lambda i: (0, 0, 0)),  # conv taps
                pl.BlockSpec((C_out, 1), lambda i: (0, 0)),           # bias
            ],
            out_specs=pl.BlockSpec((nb, C_out, Ld), lambda i: (i, 0, 0)),
        ),
        compiler_params=pltpu.CompilerParams(
            dimension_semantics=("parallel",),
            # Double-buffered x/out blocks are capped by max_step_bytes, so the
            # total footprint stays well under v7x's 64 MiB physical VMEM while
            # leaving v5e/v6e (128 MiB) plenty of headroom.
            vmem_limit_bytes=48 * 1024 * 1024,
        ),
    )(x, p_mat, w3, b2)

    return out


def downsampling_reference(x, weight, bias, factor):
    """Pure-JAX reference matching PyTorch semantics (f32)."""
    B, C_in, L = x.shape
    Ld = L // factor
    xp = x[:, :, :Ld * factor].reshape(B, C_in, Ld, factor).mean(axis=-1)  # AvgPool1d
    out = jax.lax.conv_general_dilated(
        xp, weight,
        window_strides=(1,),
        padding=[(1, 1)],
        dimension_numbers=("NCH", "OIH", "NCH"),
        precision=jax.lax.Precision.HIGHEST,
    )
    out = out + bias[None, :, None]
    return jnp.maximum(out, 0.0)                                            # ReLU


if __name__ == "__main__":
    # small shapes consistent with the module's forward: (B, C, L)
    B, C_in, C_out, L, factor = 2, 4, 8, 16, 2

    key = jax.random.PRNGKey(0)
    kx, kw, kb = jax.random.split(key, 3)
    x = jax.random.normal(kx, (B, C_in, L), dtype=jnp.float32)
    # deterministic synthetic parameters (Conv1d weight (C_out, C_in, 3), bias (C_out,))
    weight = 0.1 * jax.random.normal(kw, (C_out, C_in, 3), dtype=jnp.float32)
    bias = 0.1 * jax.random.normal(kb, (C_out,), dtype=jnp.float32)

    ref = downsampling_reference(x, weight, bias, factor)

    # Exact-semantics path: f32 MXU operands (default precision), tight tolerance.
    out_f32 = jax.block_until_ready(
        downsampling_pallas(x, weight, bias, factor, mxu_dtype=jnp.float32))
    np.testing.assert_allclose(np.asarray(out_f32), np.asarray(ref),
                               rtol=1e-4, atol=1e-4)

    # Default optimized path: bf16 MXU operands, f32 accumulation (loose tolerance).
    out_bf16 = jax.block_until_ready(
        downsampling_pallas(x, weight, bias, factor))
    np.testing.assert_allclose(np.asarray(out_bf16), np.asarray(ref),
                               rtol=2e-2, atol=2e-2)

    print("KERNEL_OK")
</pallas_src>

<mosaic_0001>
module attributes {stable_mosaic.version = 11 : i64} {
  func.func @_down_kernel(%arg0: i32, %arg1: memref<1x4x16xf32, #tpu.memory_space<vmem>>, %arg2: memref<16x8xf32, #tpu.memory_space<vmem>>, %arg3: memref<3x8x4xf32, #tpu.memory_space<vmem>>, %arg4: memref<8x1xf32, #tpu.memory_space<vmem>>, %arg5: memref<1x8x8xf32, #tpu.memory_space<vmem>>) attributes {dimension_semantics = [#tpu.dimension_semantics<parallel>], iteration_bounds = array<i64: 2>, scalar_prefetch = 0 : i64, scratch_operands = 0 : i64, tpu.core_type = #tpu.core_type<tc>, window_params = [{transform_indices = @transform_0, window_bounds = array<i64: 1, 4, 16>}, {pipeline_mode = #tpu.pipeline_mode<synchronous>, transform_indices = @transform_1, window_bounds = array<i64: 16, 8>}, {pipeline_mode = #tpu.pipeline_mode<synchronous>, transform_indices = @transform_2, window_bounds = array<i64: 3, 8, 4>}, {pipeline_mode = #tpu.pipeline_mode<synchronous>, transform_indices = @transform_3, window_bounds = array<i64: 8, 1>}, {transform_indices = @transform_4, window_bounds = array<i64: 1, 8, 8>}]} {
    %c0 = arith.constant 0 : index
    %c0_0 = arith.constant 0 : index
    %0 = vector.load %arg2[%c0, %c0_0] : memref<16x8xf32, #tpu.memory_space<vmem>>, vector<16x8xf32>
    %c0_1 = arith.constant 0 : index
    %c0_2 = arith.constant 0 : index
    %c0_3 = arith.constant 0 : index
    %1 = vector.load %arg3[%c0_1, %c0_2, %c0_3] : memref<3x8x4xf32, #tpu.memory_space<vmem>>, vector<1x8x4xf32>
    %2 = vector.shape_cast %1 : vector<1x8x4xf32> to vector<8x4xf32>
    %c1 = arith.constant 1 : index
    %c0_4 = arith.constant 0 : index
    %c0_5 = arith.constant 0 : index
    %3 = vector.load %arg3[%c1, %c0_4, %c0_5] : memref<3x8x4xf32, #tpu.memory_space<vmem>>, vector<1x8x4xf32>
    %4 = vector.shape_cast %3 : vector<1x8x4xf32> to vector<8x4xf32>
    %c2 = arith.constant 2 : index
    %c0_6 = arith.constant 0 : index
    %c0_7 = arith.constant 0 : index
    %5 = vector.load %arg3[%c2, %c0_6, %c0_7] : memref<3x8x4xf32, #tpu.memory_space<vmem>>, vector<1x8x4xf32>
    %6 = vector.shape_cast %5 : vector<1x8x4xf32> to vector<8x4xf32>
    %c0_8 = arith.constant 0 : index
    %c0_9 = arith.constant 0 : index
    %7 = vector.load %arg4[%c0_8, %c0_9] : memref<8x1xf32, #tpu.memory_space<vmem>>, vector<8x1xf32>
    %8 = tpu.iota {dimensions = array<i32: 1>} : vector<1x8xi32>
    %c0_i32 = arith.constant 0 : i32
    %9 = vector.broadcast %c0_i32 : i32 to vector<1x8xi32>
    %10 = arith.cmpi sgt, %8, %9 : vector<1x8xi32>
    %11 = arith.extui %10 : vector<1x8xi1> to vector<1x8xi32>
    %12 = arith.sitofp %11 : vector<1x8xi32> to vector<1x8xf32>
    %c7_i32 = arith.constant 7 : i32
    %13 = vector.broadcast %c7_i32 : i32 to vector<1x8xi32>
    %14 = arith.cmpi slt, %8, %13 : vector<1x8xi32>
    %15 = arith.extui %14 : vector<1x8xi1> to vector<1x8xi32>
    %16 = arith.sitofp %15 : vector<1x8xi32> to vector<1x8xf32>
    %c0_10 = arith.constant 0 : index
    %c0_11 = arith.constant 0 : index
    %c0_12 = arith.constant 0 : index
    %17 = vector.load %arg1[%c0_10, %c0_11, %c0_12] : memref<1x4x16xf32, #tpu.memory_space<vmem>>, vector<1x4x16xf32>
    %18 = vector.shape_cast %17 : vector<1x4x16xf32> to vector<4x16xf32>
    %cst = arith.constant dense<0.000000e+00> : vector<4x8xf32>
    %19 = tpu.matmul %18, %0, %cst {dimension_numbers = #tpu.dot_dimension_numbers<[1], [0], [0], [1], [0, 0, 1, 1], [], []>} : vector<4x16xf32>, vector<16x8xf32>, vector<4x8xf32> -> vector<4x8xf32>
    %c1_i32 = arith.constant 1 : i32
    %20 = tpu.dynamic_rotate %19 by %c1_i32 dim 1 : vector<4x8xf32>, i32 -> vector<4x8xf32>
    %21 = vector.broadcast %12 : vector<1x8xf32> to vector<4x8xf32>
    %22 = arith.mulf %20, %21 : vector<4x8xf32>
    %c7_i32_13 = arith.constant 7 : i32
    %23 = tpu.dynamic_rotate %19 by %c7_i32_13 dim 1 : vector<4x8xf32>, i32 -> vector<4x8xf32>
    %24 = vector.broadcast %16 : vector<1x8xf32> to vector<4x8xf32>
    %25 = arith.mulf %23, %24 : vector<4x8xf32>
    %cst_14 = arith.constant dense<0.000000e+00> : vector<8x8xf32>
    %26 = tpu.matmul %4, %19, %cst_14 {dimension_numbers = #tpu.dot_dimension_numbers<[1], [0], [0], [1], [0, 0, 1, 1], [], []>} : vector<8x4xf32>, vector<4x8xf32>, vector<8x8xf32> -> vector<8x8xf32>
    %cst_15 = arith.constant dense<0.000000e+00> : vector<8x8xf32>
    %27 = tpu.matmul %2, %22, %cst_15 {dimension_numbers = #tpu.dot_dimension_numbers<[1], [0], [0], [1], [0, 0, 1, 1], [], []>} : vector<8x4xf32>, vector<4x8xf32>, vector<8x8xf32> -> vector<8x8xf32>
    %28 = arith.addf %26, %27 : vector<8x8xf32>
    %cst_16 = arith.constant dense<0.000000e+00> : vector<8x8xf32>
    %29 = tpu.matmul %6, %25, %cst_16 {dimension_numbers = #tpu.dot_dimension_numbers<[1], [0], [0], [1], [0, 0, 1, 1], [], []>} : vector<8x4xf32>, vector<4x8xf32>, vector<8x8xf32> -> vector<8x8xf32>
    %30 = arith.addf %28, %29 : vector<8x8xf32>
    %31 = vector.broadcast %7 : vector<8x1xf32> to vector<8x8xf32>
    %32 = arith.addf %30, %31 : vector<8x8xf32>
    %cst_17 = arith.constant 0.000000e+00 : f32
    %33 = vector.broadcast %cst_17 : f32 to vector<8x8xf32>
    %34 = arith.maximumf %32, %33 : vector<8x8xf32>
    %c0_18 = arith.constant 0 : index
    %c0_19 = arith.constant 0 : index
    %c0_20 = arith.constant 0 : index
    %35 = vector.load %arg5[%c0_18, %c0_19, %c0_20] : memref<1x8x8xf32, #tpu.memory_space<vmem>>, vector<1x8x8xf32>
    %36 = vector.shape_cast %35 : vector<1x8x8xf32> to vector<8x8xf32>
    %37 = vector.shape_cast %34 : vector<8x8xf32> to vector<1x8x8xf32>
    tpu.vector_store %arg5[%c0_18, %c0_19, %c0_20], %37 {strides = array<i32>} : memref<1x8x8xf32, #tpu.memory_space<vmem>>, vector<1x8x8xf32>,
    return
  }
  func.func @transform_0(%arg0: i32) -> (i32, i32, i32) {
    %c0_i32 = arith.constant 0 : i32
    %c0_i32_0 = arith.constant 0 : i32
    %c0_i32_1 = arith.constant 0 : i32
    return %arg0, %c0_i32, %c0_i32_0 : i32, i32, i32
  }
  func.func @transform_1(%arg0: i32) -> (i32, i32) {
    %c0_i32 = arith.constant 0 : i32
    %c0_i32_0 = arith.constant 0 : i32
    %c0_i32_1 = arith.constant 0 : i32
    return %c0_i32, %c0_i32_0 : i32, i32
  }
  func.func @transform_2(%arg0: i32) -> (i32, i32, i32) {
    %c0_i32 = arith.constant 0 : i32
    %c0_i32_0 = arith.constant 0 : i32
    %c0_i32_1 = arith.constant 0 : i32
    %c0_i32_2 = arith.constant 0 : i32
    return %c0_i32, %c0_i32_0, %c0_i32_1 : i32, i32, i32
  }
  func.func @transform_3(%arg0: i32) -> (i32, i32) {
    %c0_i32 = arith.constant 0 : i32
    %c0_i32_0 = arith.constant 0 : i32
    %c0_i32_1 = arith.constant 0 : i32
    return %c0_i32, %c0_i32_0 : i32, i32
  }
  func.func @transform_4(%arg0: i32) -> (i32, i32, i32) {
    %c0_i32 = arith.constant 0 : i32
    %c0_i32_0 = arith.constant 0 : i32
    %c0_i32_1 = arith.constant 0 : i32
    return %arg0, %c0_i32, %c0_i32_0 : i32, i32, i32
  }
}

</mosaic_0001>

<bundles_post_ra>
// kernel: tpu_custom_call.1
= control target key start
LH: loop header
LB: loop body
LE: loop exit
PB: predicated region body
PF: predicated region fallthrough
CT: control target
= control target key end

     0   :  { %9 = vsyncpa [#allocation3], 0  ;;  %s943_s0 = inlined_call_operand.vmem [shape: f32[2,4,16], index: 0, kind: input, shape index: {}]   ;;  %s944_s1 = inlined_call_operand.vmem [shape: f32[16,8], index: 1, kind: input, shape index: {}]   ;;  %s945_s2 = inlined_call_operand.vmem [shape: f32[3,8,4], index: 2, kind: input, shape index: {}]   ;;  %s946_s3 = inlined_call_operand.vmem [shape: f32[8,1], index: 3, kind: input, shape index: {}]   ;;  %s947_s4 = inlined_call_operand.hbm [shape: f32[2,8,8], index: 4, kind: output, shape index: {}]  }
   0x1   :  { %11 = vsyncpa [#allocation3 + $0x1], 0  ;;  %s821_s15 = smov 0   ;;  %s823_s16 = smov 0  }
   0x2   :  { %s825_s17 = smov 0   ;;  %s827_s18 = smov 0  }
   0x3 LB: > { %s842_s19 = sadd.s32 4294967295, %s784_s18   ;;  %s618_s20 = sadd.s32 4294967294, %s784_s18   ;;  %s784_s18 = sphi %s827_s18, %s953_s18   ;;  %s780_s17 = sphi %s825_s17, %s952_s17   ;;  %s776_s16 = sphi %s823_s16, %s951_s16   ;;  %s772_s15 = sphi %s821_s15, %s950_s15  }
   0x4   : > { %s846_s21 = sadd.s32 1, %s784_s18   ;;  %s113_s22 = sadd.s32 1, %s780_s17 }
   0x5   : > { %s110_s23 = ssub.s32 %s784_s18, %s846_s21  ;;  %p123_p0 = scmp.ne.s32.totalorder %s780_s17, %s776_s16 }
   0x6   : > { %p111_p1 = scmp.eq.s32.totalorder %s110_s23, 0  ;;  %p124_p2 = scmp.eq.s32.totalorder %s842_s19, 1 }
   0x7   : > { %p129_p3 = scmp.ne.s32.totalorder %s776_s16, %s772_s15  ;;  %p130_p4 = scmp.eq.s32.totalorder %s618_s20, 1 }
   0x8   : > { %s857_s24 = scalar_select %p111_p1, %s780_s17, %s113_s22  }
   0x9   : > { %p859_p5 = por %p124_p2, %p123_p0  ;;  %p863_p6 = por %p130_p4, %p129_p3 }
   0xa   : > { %p621_p7 = scmp.ge.s32.totalorder %s784_s18, 1  ;;  %p164_p8 = scmp.lt.s32.totalorder %s784_s18, 3 }
   0xc   : > { %p165_p9 = pnand %p621_p7, %p164_p8 }
   0xd   : > { %v193_v0 = vld [vmem:[%s944_s1] sm:$0xff] (!%p165_p9)  ;;  %v194_v1 = vld [vmem:[%s944_s1 + $0x8] sm:$0xff] (!%p165_p9)  ;;  %p189_p10 = scmp.lt.s32.totalorder (!%p165_p9), %s842_s19, 1  ;;  %v786_v2 = vmov (!%p165_p9), 0.0|0.0   ;;  %vm787_vm0 = vmmov (!%p165_p9), 0   ;;  %v788_v4 = vmov (!%p165_p9), 0.0   ;;  %v201_v6 = vlaneseq (!%p165_p9) }
   0xe   : > { %168 = sbr.rel (%p165_p9) target bundleno = 826 (0x33a), region = 36  ;;  %670 = vmatprep.subr.bf16.mxu0 (!%p165_p9), %v786_v2  ;;  %v671_v3 = vpack.c.bf16 (!%p165_p9), %v194_v1, %v193_v0  ;;  %652 = vmatprep.mubr.msk.f32.mxu0 (!%p165_p9), %vm787_vm0, %v788_v4  ;;  %vm210_vm1 = vcmask (!%p165_p9), 130048   ;;  %s789_s10 = smov (!%p165_p9), 7   ;;  %vm284_vm4 = vcmask (!%p165_p9), 1047616   ;;  %v792_v15 = vmov (!%p165_p9), 0   ;;  %v200_v21 = vld [vmem:[%s946_s3] sm:$0xff] (!%p165_p9) }
   0xf   : > { %655 = vmatprep.subr.mxu1 (!%p165_p9), %v788_v4  ;;  %657 = vmatprep.mubr.msk.f32.mxu1 (!%p165_p9), %vm787_vm0, %v788_v4  ;;  %v202_v7 = vand.u32 (!%p165_p9), 127, %v201_v6  ;;  %s790_s11 = smov (!%p165_p9), 1   ;;  %s791_s12 = smov (!%p165_p9), 8   ;;  %vm308_vm5 = vcmask (!%p165_p9), 1043456   ;;  %v195_v22 = vld [vmem:[%s945_s2] sm:$0xff] (!%p165_p9)  ;;  %vm304_vm6 = vcmask (!%p165_p9), 31744  }
  0x10   : > { %672 = vmatpush3.bf16.msra.mxu0 (!%p165_p9), %v671_v3  ;;  %721 = vset.pattern.permute.xlu0 (!%p165_p9), %v792_v15  ;;  %s793_s13 = smov (!%p165_p9), 127   ;;  %s794_s14 = smov (!%p165_p9), 121   ;;  %v625_v25 = vld [vmem:[%s945_s2 + $0x10] sm:$0xff] (!%p165_p9)  ;;  %v624_v26 = vld [vmem:[%s945_s2 + $0x8] sm:$0xff] (!%p165_p9)  ;;  %vm543_vm7 = vcmask (!%p165_p9), 64512  }
  0x11   : > { %665 = vmatprep.subr.mxu0 (!%p165_p9), %v788_v4  ;;  %vm203_vm2 = vcmp.gt.s32.totalorder (!%p165_p9), %v202_v7, 0  ;;  %vm206_vm3 = vcmp.lt.s32.totalorder (!%p165_p9), %v202_v7, 7  ;;  %s636_s8 = sshll.u32 (!%p165_p9), %s842_s19, 7 }
  0x12   : > { %v626_v8 = vsel (!%p165_p9), %vm203_vm2, 1.0, %v788_v4  ;;  %v627_v9 = vsel (!%p165_p9), %vm206_vm3, 1.0, %v788_v4 }
  0x13   : > { %292 = vrot.lane.b32.xlu1 (!%p165_p9), %v626_v8, %s789_s10 }
  0x15   : > { %s190_s5 = scalar_select %p189_p10, %s842_s19, 1 }
  0x16   : > { %s795_s19 = smov [#allocation2]  }
  0x17   : > { %s623_s6 = sshll.u32 %s190_s5, 2  ;;  %297 = vrot.lane.b32.xlu1 %v627_v9, %s790_s11  ;;  %s726_s22 = sshll.u32 %s795_s19, 4  ;;  %s727_s22 = int_to_ptr.vmem [resolvable:$false] %s726_s22 }
  0x18   : > { %s192_s9 = scalar_lea.vmem %s943_s0, %s623_s6  ;;  %s186_s6 = sand.u32 1, %s776_s16  }
  0x19   : > { %v209_v5 = vld [vmem:[%s192_s9] sm:$0xf]  ;;  %s622_s7 = sshll.u32 %s186_s6, 3  ;;  %s728_s23 = scalar_lea.vmem %s727_s22, 256 }
  0x1a   : > { %653 = vmatmul.mubr.msk.f32.vlgmr.msra.gmra.mrb[0].mxu0 %vm210_vm1, %v209_v5  ;;  %s188_s9 = scalar_lea.vmem [#allocation2], %s622_s7 }
  0x1b   : > { %667 = vmatprep.mubr.msk.f32.mxu0 %vm787_vm0, %v788_v4  ;;  %s559_s10 = sshll.u32 %s188_s9, 4  ;;  %s903_s10 = int_to_ptr.vmem [resolvable:$true] %s559_s10 }
  0x1c   : > { %s722_s20 = scalar_lea.vmem %s903_s10, 128  ;;  %p729_p0 = scmp.lt.s32.totalorder %s903_s10, %s727_s22 }
  0x1d   : > { %p723_p11 = scmp.ne.s32.totalorder %s903_s10, %s722_s20  ;;  %p730_p1 = scmp.lt.s32.totalorder %s728_s23, %s722_s20 }
  0x1f   : > { %p724_p12 = pnand %p723_p11, %p859_p5  ;;  %p731_p2 = por %p730_p1, %p729_p0 }
  0x21   : > { %p725_p13 = pneg %p724_p12 }
  0x23   : > { %p732_p3 = pnand %p731_p2, %p725_p13 }
  0x85   : > { %v293_v14 = vpop.permute.xlu1 %292 }
  0x89   : > { %v298_v16 = vpop.permute.xlu1 %297 }
  0xed   : > { %v280_v10 = vpop.f32.mrb[0].mxu0 }
  0xee   : > { %285 = vrot.lane.b32.xlu0 %v280_v10, %s791_s12  ;;  %v654_v11 = vpop.f32.mrb[1].mxu0 }
 0x160   : > { %v286_v12 = vpop.permute.xlu0 %285 }
 0x161   : > { %v287_v13 = vsel %vm284_vm4, %v286_v12, %v280_v10 }
 0x162   : > { %288 = vrot.lane.b32.xlu0 %v287_v13, %s791_s12 }
 0x1d4   : > { %v289_v17 = vpop.permute.xlu0 %288 }
 0x1d5   : > { %v290_v18 = vsel %vm284_vm4, %v289_v17, %v280_v10 }
 0x1d6   : > { %v295_v19 = vmul.f32 %v293_v14, %v290_v18  ;;  %v300_v20 = vmul.f32 %v298_v16, %v290_v18 }
 0x1d8   : > { %458 = vrot.lane.b32.xlu1 %v300_v20, %s793_s13  ;;  %302 = vrot.lane.b32.xlu0 %v295_v19, %s794_s14  ;;  %s901_s13 = scalar_lea.hbm %s947_s4, %s636_s8  ;;  %s546_s14 = scalar_lea.sflag [#allocation3], %s186_s6 }
 0x1dc   : > { %538 = vperm.xlu0 %721, %v200_v21  }
 0x24a   : > { %v459_v23 = vpop.permute.xlu1 %458  ;;  %v303_v24 = vpop.permute.xlu0 %302 }
 0x24b   : > { %656 = vmatpush3.msk.msra.mxu1 %vm308_vm5, %v303_v24  ;;  %666 = vmatpush3.msk.msra.mxu0 %vm308_vm5, %v459_v23 }
 0x24c   : > { %658 = vmatmul.mubr.msk.f32.vlgmr.msra.gmra.mrb[0].mxu1 %vm304_vm6, %v195_v22  ;;  %660 = vmatprep.subr.mxu1 %v788_v4 }
 0x24d   : > { %661 = vmatpush3.msk.msra.mxu1 %vm308_vm5, %v280_v10  ;;  %662 = vmatprep.mubr.msk.f32.mxu1 %vm787_vm0, %v788_v4 }
 0x24e   : > { %668 = vmatmul.mubr.msk.f32.vlgmr.msra.gmra.mrb[2].mxu0 %vm304_vm6, %v625_v25 }
 0x250   : > { %663 = vmatmul.mubr.msk.f32.vlgmr.msra.gmra.mrb[2].mxu1 %vm304_vm6, %v624_v26 }
 0x25b   : > { %v539_v34 = vpop.permute.xlu0 %538 }
 0x31f   : > { %v377_v27 = vpop.f32.mrb[0].mxu1 }
 0x320   : > { %v659_v28 = vpop.f32.mrb[1].mxu1 }
 0x321   : > { %v531_v29 = vpop.f32.mrb[2].mxu0 }
 0x322   : > { %v669_v30 = vpop.f32.mrb[3].mxu0 }
 0x323   : > { %v453_v31 = vpop.f32.mrb[2].mxu1 }
 0x324   : > { %v454_v32 = vadd.f32 %v453_v31, %v377_v27  ;;  %v664_v33 = vpop.f32.mrb[3].mxu1 }
 0x326   : > { %v535_v35 = vadd.f32 %v531_v29, %v454_v32 }
 0x328   : > { %v541_v36 = vadd.f32 %v539_v34, %v535_v35 }
 0x32a   : > { %v542_v37 = vmax.f32 %v541_v36, 0.0 }
 0x32c   : > { %544 = vst.msk [vmem:[%s188_s9] sm:$0xff] %vm543_vm7, %v542_v37 }
 0x32d   : > { %735 = shalt.err (!%p732_p3)
}
 0x32e   : > { %s736_s27 = scalar_lea.hbm %s901_s13, 128  ;;  %s740_s30 = scalar_lea.hbm %s947_s4, 256 }
 0x32f   : > { %p737_p4 = scmp.ne.s32.totalorder %s901_s13, %s736_s27  ;;  %p741_p9 = scmp.lt.u32.totalorder %s901_s13, %s947_s4 }
 0x330   : > { %p742_p10 = scmp.lt.u32.totalorder %s740_s30, %s736_s27  ;;  %p744_p12 = scmp.lt.u32.totalorder %s736_s27, %s901_s13 }
 0x331   : > { %p738_p7 = pnand %p737_p4, %p859_p5 }
 0x332   : > { %p743_p11 = por %p742_p10, %p741_p9 }
 0x333   : > { %p739_p8 = pneg %p738_p7 }
 0x334   : > { %p745_p13 = por %p744_p12, %p743_p11 }
 0x336   : > { %p746_p0 = pnand %p745_p13, %p739_p8 }
 0x338   : > { %749 = shalt.err (!%p746_p0)
}
 0x339   : > { %673 = dma.vmem_to_hbm [thread:$0]  (%p859_p5), %s903_s10, 128, %s901_s13, %s546_s14  }
 0x33a PF: > { %p679_p1 = scmp.ge.s32.totalorder %s784_s18, 2  ;;  %s571_s7 = sand.u32 1, %s772_s15  }
 0x33b   : > { %s572_s8 = scalar_lea.sflag [#allocation3], %s571_s7 }
 0x33c   : > { %p676_p2 = pnand %p679_p1, %p863_p6 }
 0x33e   : > { %767 = dma.done.wait (!%p676_p2), %s572_s8, 128  }
 0x33f   : > { %769 = vsyncadd (!%p676_p2), %s572_s8, 4294967168  ;;  %p14_p3 = scmp.ge.s32.totalorder %s846_s21, 4   ;;  %s950_s15 = smov %s776_s16 }
 0x340   : > { %s951_s16 = smov %s780_s17  ;;  %s952_s17 = smov %s857_s24 }
 0x341   : > { %s953_s18 = smov %s846_s21  ;;  %16 = sbr.rel (!%p14_p3) target bundleno = 3 (0x3), region = 73 }
 0x348   :  { %577 = vsyncpa [#allocation3], 1 }
 0x349   :  { %579 = vsyncpa [#allocation3 + $0x1], 1 }

</bundles_post_ra>
